<compile_context>
chip_gen: v5e
topology: v5e:2x2
jax: 0.10.0
libtpu: 0.0.40
codegen_flags: <defaults>
</compile_context>

<pallas_src>
import functools

import jax
import jax.numpy as jnp
from jax import lax
from jax.experimental import pallas as pl
from jax.experimental.pallas import tpu as pltpu


def _round_up(x, m):
    return (x + m - 1) // m * m


# ---------------------------------------------------------------------------
# Kernel 1: statistics pass.
#   Accumulates per-group input sums [G, C_in] and the global sum of squared
#   activations [1, C_out]; both are VMEM-resident output accumulators across
#   the row-tile grid.
# ---------------------------------------------------------------------------
def _stats_kernel(inp_ref, w_ref, gid_ref, ginp_ref, ssq_ref, *, n_rows):
    i = pl.program_id(0)

    @pl.when(i == 0)
    def _():
        ginp_ref[...] = jnp.zeros_like(ginp_ref)
        ssq_ref[...] = jnp.zeros_like(ssq_ref)

    tm = inp_ref.shape[0]
    g = ginp_ref.shape[0]

    # The input is NOT padded in HBM: the last tile may be partial, and its
    # stale VMEM rows must not pollute the statistics -> mask them to zero.
    rows = lax.broadcasted_iota(jnp.int32, (tm, 1), 0)
    row_ok = rows < (n_rows - i * tm)
    inp = jnp.where(row_ok, inp_ref[...], 0.0)                  # [TM, C_in]

    x = jnp.dot(inp, w_ref[...], preferred_element_type=jnp.float32)
    ssq_ref[...] += jnp.sum(x * x, axis=0, keepdims=True)

    gid = gid_ref[...]                                          # [TM, 1] int32
    # Per-group sums on the narrow C_in-wide input; G ('flag') is a handful so
    # a tiny static unroll is fine (pad rows carry gid == G -> no match).
    sums = [jnp.sum(jnp.where(gid == gg, inp, 0.0), axis=0, keepdims=True)
            for gg in range(g)]
    ginp_ref[...] += jnp.concatenate(sums, axis=0)


# ---------------------------------------------------------------------------
# Kernel 2 (two phases over the same row tiles):
#   phase 0: linear + folded affine + ReLU + scatter-max into the VMEM-resident
#            xmax accumulator.
#   phase 1: recompute y, gather x_max[unq_inv] from the resident accumulator
#            and write the fused [N, 2*C_out] concat output directly.
#   Pillar ids arrive via scalar prefetch (SMEM) and drive 8-row-unrolled loops.
# ---------------------------------------------------------------------------
def _fused_kernel(inv_sm, inp_ref, w_ref, gid_ref, scale_ref, off_ref,
                  out_ref, xmax_ref, y_ref, gath_ref, *, n_rows):
    ph = pl.program_id(0)            # 0: build xmax, 1: gather + emit
    i = pl.program_id(1)
    tm = inp_ref.shape[0]
    g = off_ref.shape[0]
    base = i * tm
    n_chunks = tm // 8

    @pl.when((ph == 0) & (i == 0))
    def _():
        # y >= 0 after ReLU, so 0 is a safe identity for the running max (and a
        # sane value for the dummy slot used by padded rows).
        xmax_ref[...] = jnp.zeros_like(xmax_ref)

    # Recompute x = inp @ W in both phases (K=10 matmul is ~free on the MXU)
    # rather than round-tripping the C_out-wide activation through HBM.
    rows = lax.broadcasted_iota(jnp.int32, (tm, 1), 0)
    row_ok = rows < (n_rows - base)
    inp = jnp.where(row_ok, inp_ref[...], 0.0)                  # [TM, C_in]
    x = jnp.dot(inp, w_ref[...], preferred_element_type=jnp.float32)

    # Per-row affine offset via a one-hot [TM, G] @ [G, C] matmul (MXU) rather
    # than G masked selects on the VPU.  Padded rows have gid == G -> zero row.
    gid = gid_ref[...]                                          # [TM, 1] int32
    iota_g = lax.broadcasted_iota(jnp.int32, (tm, g), 1)
    onehot = (gid == iota_g).astype(jnp.float32)                # [TM, G]
    off = jnp.dot(onehot, off_ref[...], preferred_element_type=jnp.float32)

    y = jnp.maximum(x * scale_ref[...] + off, 0.0)              # [TM, C_out]

    @pl.when(ph == 0)
    def _scatter():
        # Scatter-max: row-wise read-modify-write into the resident xmax
        # accumulator, statically unrolled 8 rows per fori_loop step so the
        # scheduler can overlap the SMEM id reads / y-row loads of independent
        # rows.  Padded rows point at the dummy pillar slot.
        y_ref[...] = y

        def chunk(ci, carry):
            r0 = pl.multiple_of(ci * 8, 8)
            for dr in range(8):
                r = r0 + dr
                pid = inv_sm[base + r]
                xmax_ref[pl.ds(pid, 1), :] = jnp.maximum(
                    xmax_ref[pl.ds(pid, 1), :], y_ref[pl.ds(r, 1), :])
            return carry

        lax.fori_loop(0, n_chunks, chunk, 0)

    @pl.when(ph == 1)
    def _emit():
        # Gather x_max[unq_inv] straight out of the (now complete) resident
        # accumulator into a VMEM scratch, then emit one lane-dense
        # [TM, 2*C_out] store with the concat fused in.
        def chunk(ci, carry):
            r0 = pl.multiple_of(ci * 8, 8)
            for dr in range(8):
                r = r0 + dr
                pid = inv_sm[base + r]
                gath_ref[pl.ds(r, 1), :] = xmax_ref[pl.ds(pid, 1), :]
            return carry

        lax.fori_loop(0, n_chunks, chunk, 0)
        out_ref[...] = jnp.concatenate([y, gath_ref[...]], axis=1)


# ---------------------------------------------------------------------------
# Wrapper (tiny [G, C] statistics math; no big padded copies, no XLA gather)
# ---------------------------------------------------------------------------
def pfn_layer_v2_forward(inputs, unq_inv, points, flag, weight_t, gamma, beta,
                         *, alpha, num_pillars, eps=1e-3, last_vfe=False,
                         tm=1024):
    n, c_in = inputs.shape
    c_out = weight_t.shape[1]
    g = int(flag)
    p = int(num_pillars)

    tm = min(int(tm), _round_up(n, 8))
    assert tm % 8 == 0
    num_tiles = pl.cdiv(n, tm)
    n_pad = num_tiles * tm               # only the tiny int32 id arrays pad
    p_pad = _round_up(p + 1, 8)          # +1 dummy slot for padded rows

    inp_f = inputs.astype(jnp.float32)   # NOT padded / copied
    w_f = weight_t.astype(jnp.float32)
    gid = points[:, 0].astype(jnp.int32)
    gid_p = jnp.full((n_pad, 1), g, jnp.int32).at[:n, 0].set(gid)
    inv_p = jnp.full((n_pad,), p, jnp.int32).at[:n].set(
        unq_inv.astype(jnp.int32))

    # ---- Pass 1: statistics ------------------------------------------------
    ginp, ssq = pl.pallas_call(
        functools.partial(_stats_kernel, n_rows=n),
        out_shape=(
            jax.ShapeDtypeStruct((g, c_in), jnp.float32),
            jax.ShapeDtypeStruct((1, c_out), jnp.float32),
        ),
        grid=(num_tiles,),
        in_specs=[
            pl.BlockSpec((tm, c_in), lambda i: (i, 0)),
            pl.BlockSpec((c_in, c_out), lambda i: (0, 0)),
            pl.BlockSpec((tm, 1), lambda i: (i, 0)),
        ],
        out_specs=(
            pl.BlockSpec((g, c_in), lambda i: (0, 0)),
            pl.BlockSpec((1, c_out), lambda i: (0, 0)),
        ),
        compiler_params=pltpu.CompilerParams(
            dimension_semantics=("arbitrary",)),
    )(inp_f, w_f, gid_p)

    # Tiny [G, C] statistics glue (training-mode BatchNorm1dV2).
    counts = jnp.bincount(gid, length=g).astype(jnp.float32)            # [G]
    gsum = jnp.dot(ginp, w_f, precision=lax.Precision.HIGHEST)          # [G, C]
    group_mean = gsum / counts[:, None]
    batch_mean = jnp.sum(gsum, axis=0) / n
    batch_var = jnp.maximum(ssq[0] / n - batch_mean * batch_mean, 0.0)
    inv_std = 1.0 / jnp.sqrt(batch_var + eps)
    shift = batch_mean[None, :] + alpha * (group_mean - batch_mean[None, :])
    scale = (gamma.astype(jnp.float32) * inv_std)[None, :]              # [1, C]
    offset = beta.astype(jnp.float32)[None, :] - shift * scale          # [G, C]

    # ---- Pass 2: scatter-max (phase 0) + fused gather/concat (phase 1) ------
    out_full, xmax_pad = pl.pallas_call(
        functools.partial(_fused_kernel, n_rows=n),
        out_shape=(
            jax.ShapeDtypeStruct((n, 2 * c_out), jnp.float32),
            jax.ShapeDtypeStruct((p_pad, c_out), jnp.float32),
        ),
        grid_spec=pltpu.PrefetchScalarGridSpec(
            num_scalar_prefetch=1,
            grid=(2, num_tiles),
            in_specs=[
                pl.BlockSpec((tm, c_in), lambda ph, i, inv: (i, 0)),
                pl.BlockSpec((c_in, c_out), lambda ph, i, inv: (0, 0)),
                pl.BlockSpec((tm, 1), lambda ph, i, inv: (i, 0)),
                pl.BlockSpec((1, c_out), lambda ph, i, inv: (0, 0)),
                pl.BlockSpec((g, c_out), lambda ph, i, inv: (0, 0)),
            ],
            out_specs=(
                # Phase 0 parks the (never-written) out block on index 0;
                # phase 1 maps tile i -> block i, so every block gets exactly
                # one clean writeback and blocks are only visited consecutively.
                pl.BlockSpec((tm, 2 * c_out), lambda ph, i, inv: (i * ph, 0)),
                pl.BlockSpec((p_pad, c_out), lambda ph, i, inv: (0, 0)),
            ),
            scratch_shapes=[
                pltpu.VMEM((tm, c_out), jnp.float32),   # y rows (phase 0)
                pltpu.VMEM((tm, c_out), jnp.float32),   # gathered rows (phase 1)
            ],
        ),
        compiler_params=pltpu.CompilerParams(
            dimension_semantics=("arbitrary", "arbitrary")),
    )(inv_p, inp_f, w_f, gid_p, scale, offset)

    if last_vfe:
        return xmax_pad[:p]
    return out_full


# ---------------------------------------------------------------------------
# Pure-JAX reference (mirrors the torch forward, points grouped by batch)
# ---------------------------------------------------------------------------
def pfn_layer_v2_reference(inputs, unq_inv, points, flag, weight_t, gamma, beta,
                           *, alpha, num_pillars, eps=1e-3, last_vfe=False):
    x = jnp.dot(inputs, weight_t, precision=lax.Precision.HIGHEST)
    gid = points[:, 0]
    batch_mean = jnp.mean(x, axis=0)
    batch_var = jnp.mean((x - batch_mean) ** 2, axis=0)
    gms = []
    for i in range(flag):
        m = gid == i
        gms.append(jnp.sum(jnp.where(m[:, None], x, 0.0), axis=0) / jnp.sum(m))
    group_mean = jnp.stack(gms)
    shift = batch_mean + alpha * (group_mean[gid] - batch_mean)
    x_norm = (x - shift) / jnp.sqrt(batch_var + eps)
    y = jax.nn.relu(gamma * x_norm + beta)
    x_max = jax.ops.segment_max(y, unq_inv, num_segments=int(num_pillars))
    if last_vfe:
        return x_max
    return jnp.concatenate([y, x_max[unq_inv]], axis=1)


if __name__ == "__main__":
    key = jax.random.PRNGKey(0)

    flag = 2                      # number of point-cloud samples in the batch
    n_per_batch = 64
    n = flag * n_per_batch
    c_in = 10                     # classic pillar point-feature size
    out_channels = 64             # PFNLayerV2(last_layer=False) -> linear out = 32
    c_out = out_channels // 2
    alpha = 0.5
    pillars_per_batch = 12
    num_pillars = flag * pillars_per_batch

    k_in, k_w, k_inv = jax.random.split(key, 3)
    inputs = jax.random.normal(k_in, (n, c_in), jnp.float32)
    weight_t = 0.1 * jax.random.normal(k_w, (c_in, c_out), jnp.float32)  # W.T
    gamma = jnp.ones((c_out,), jnp.float32)    # norm.weight
    beta = jnp.zeros((c_out,), jnp.float32)    # norm.bias

    # points[:, 0] = batch index, grouped by batch (as the dynamic VFE produces)
    batch_ids = jnp.repeat(jnp.arange(flag, dtype=jnp.int32), n_per_batch)
    points = jnp.stack([batch_ids, jnp.zeros_like(batch_ids)], axis=1)

    # pillar inverse indices: each batch owns a disjoint pillar-id range and
    # every pillar id appears at least once
    rnd = jax.random.randint(k_inv, (flag, n_per_batch), 0, pillars_per_batch,
                             dtype=jnp.int32)
    rnd = rnd.at[:, :pillars_per_batch].set(
        jnp.arange(pillars_per_batch, dtype=jnp.int32)[None, :])
    unq_inv = (rnd + pillars_per_batch *
               jnp.arange(flag, dtype=jnp.int32)[:, None]).reshape(-1)

    out = pfn_layer_v2_forward(inputs, unq_inv, points, flag, weight_t, gamma,
                               beta, alpha=alpha, last_vfe=False,
                               num_pillars=num_pillars)
    out = jax.block_until_ready(out)

    ref = pfn_layer_v2_reference(inputs, unq_inv, points, flag, weight_t, gamma,
                                 beta, alpha=alpha, last_vfe=False,
                                 num_pillars=num_pillars)

    assert out.shape == (n, 2 * c_out), out.shape
    max_err = float(jnp.max(jnp.abs(out - ref)))
    assert max_err < 2e-3, f"max abs err {max_err}"
    print("KERNEL_OK")
</pallas_src>

<mosaic_0001>
module attributes {stable_mosaic.version = 11 : i64} {
  func.func @_stats_kernel(%arg0: i32, %arg1: memref<128x10xf32, #tpu.memory_space<vmem>>, %arg2: memref<10x32xf32, #tpu.memory_space<vmem>>, %arg3: memref<128x1xi32, #tpu.memory_space<vmem>>, %arg4: memref<2x10xf32, #tpu.memory_space<vmem>>, %arg5: memref<1x32xf32, #tpu.memory_space<vmem>>) attributes {dimension_semantics = [#tpu.dimension_semantics<arbitrary>], iteration_bounds = array<i64: 1>, scalar_prefetch = 0 : i64, scratch_operands = 0 : i64, tpu.core_type = #tpu.core_type<tc>, window_params = [{transform_indices = @transform_0, window_bounds = array<i64: 128, 10>}, {pipeline_mode = #tpu.pipeline_mode<synchronous>, transform_indices = @transform_1, window_bounds = array<i64: 10, 32>}, {transform_indices = @transform_2, window_bounds = array<i64: 128, 1>}, {pipeline_mode = #tpu.pipeline_mode<synchronous>, transform_indices = @transform_3, window_bounds = array<i64: 2, 10>}, {pipeline_mode = #tpu.pipeline_mode<synchronous>, transform_indices = @transform_4, window_bounds = array<i64: 1, 32>}]} {
    %c0_i32 = arith.constant 0 : i32
    %0 = arith.cmpi eq, %arg0, %c0_i32 : i32
    %1 = arith.extui %0 : i1 to i32
    %c0_i32_0 = arith.constant 0 : i32
    %2 = arith.cmpi ne, %1, %c0_i32_0 : i32
    scf.if %2 {
      %cst_22 = arith.constant 0.000000e+00 : f32
      %42 = vector.broadcast %cst_22 : f32 to vector<2x10xf32>
      %c0_23 = arith.constant 0 : index
      %c0_24 = arith.constant 0 : index
      %43 = vector.load %arg4[%c0_23, %c0_24] : memref<2x10xf32, #tpu.memory_space<vmem>>, vector<2x10xf32>
      tpu.vector_store %arg4[%c0_23, %c0_24], %42 {strides = array<i32>} : memref<2x10xf32, #tpu.memory_space<vmem>>, vector<2x10xf32>,
      %cst_25 = arith.constant 0.000000e+00 : f32
      %44 = vector.broadcast %cst_25 : f32 to vector<1x32xf32>
      %c0_26 = arith.constant 0 : index
      %c0_27 = arith.constant 0 : index
      %45 = vector.load %arg5[%c0_26, %c0_27] : memref<1x32xf32, #tpu.memory_space<vmem>>, vector<1x32xf32>
      tpu.vector_store %arg5[%c0_26, %c0_27], %44 {strides = array<i32>} : memref<1x32xf32, #tpu.memory_space<vmem>>, vector<1x32xf32>,
    } else {
    }
    %3 = tpu.iota {dimensions = array<i32: 0>} : vector<128x1xi32>
    %c128_i32 = arith.constant 128 : i32
    %4 = arith.muli %arg0, %c128_i32 : i32
    %c128_i32_1 = arith.constant 128 : i32
    %5 = arith.subi %c128_i32_1, %4 : i32
    %6 = vector.broadcast %5 : i32 to vector<128x1xi32>
    %7 = arith.cmpi slt, %3, %6 : vector<128x1xi32>
    %c0 = arith.constant 0 : index
    %c0_2 = arith.constant 0 : index
    %8 = vector.load %arg1[%c0, %c0_2] : memref<128x10xf32, #tpu.memory_space<vmem>>, vector<128x10xf32>
    %cst = arith.constant 0.000000e+00 : f32
    %9 = vector.shape_cast %7 : vector<128x1xi1> to vector<128x1xi1>
    %10 = vector.broadcast %9 : vector<128x1xi1> to vector<128x10xi1>
    %11 = vector.broadcast %cst : f32 to vector<128x10xf32>
    %12 = arith.select %10, %8, %11 : vector<128x10xi1>, vector<128x10xf32>
    %c0_3 = arith.constant 0 : index
    %c0_4 = arith.constant 0 : index
    %13 = vector.load %arg2[%c0_3, %c0_4] : memref<10x32xf32, #tpu.memory_space<vmem>>, vector<10x32xf32>
    %cst_5 = arith.constant dense<0.000000e+00> : vector<128x32xf32>
    %14 = tpu.matmul %12, %13, %cst_5 {dimension_numbers = #tpu.dot_dimension_numbers<[1], [0], [0], [1], [0, 0, 1, 1], [], []>} : vector<128x10xf32>, vector<10x32xf32>, vector<128x32xf32> -> vector<128x32xf32>
    %c0_6 = arith.constant 0 : index
    %c0_7 = arith.constant 0 : index
    %15 = vector.load %arg5[%c0_6, %c0_7] : memref<1x32xf32, #tpu.memory_space<vmem>>, vector<1x32xf32>
    %16 = arith.mulf %14, %14 : vector<128x32xf32>
    %cst_8 = arith.constant dense<0.000000e+00> : vector<32xf32>
    %17 = vector.multi_reduction <add>, %16, %cst_8 [0] : vector<128x32xf32> to vector<32xf32>
    %18 = vector.shape_cast %17 : vector<32xf32> to vector<1x32xf32>
    %19 = arith.addf %15, %18 : vector<1x32xf32>
    %c0_9 = arith.constant 0 : index
    %c0_10 = arith.constant 0 : index
    %20 = vector.load %arg5[%c0_9, %c0_10] : memref<1x32xf32, #tpu.memory_space<vmem>>, vector<1x32xf32>
    tpu.vector_store %arg5[%c0_9, %c0_10], %19 {strides = array<i32>} : memref<1x32xf32, #tpu.memory_space<vmem>>, vector<1x32xf32>,
    %c0_11 = arith.constant 0 : index
    %c0_12 = arith.constant 0 : index
    %21 = vector.load %arg3[%c0_11, %c0_12] : memref<128x1xi32, #tpu.memory_space<vmem>>, vector<128x1xi32>
    %c0_i32_13 = arith.constant 0 : i32
    %22 = vector.broadcast %c0_i32_13 : i32 to vector<128x1xi32>
    %23 = arith.cmpi eq, %21, %22 : vector<128x1xi32>
    %cst_14 = arith.constant 0.000000e+00 : f32
    %24 = vector.shape_cast %23 : vector<128x1xi1> to vector<128x1xi1>
    %25 = vector.broadcast %24 : vector<128x1xi1> to vector<128x10xi1>
    %26 = vector.broadcast %cst_14 : f32 to vector<128x10xf32>
    %27 = arith.select %25, %12, %26 : vector<128x10xi1>, vector<128x10xf32>
    %cst_15 = arith.constant dense<0.000000e+00> : vector<10xf32>
    %28 = vector.multi_reduction <add>, %27, %cst_15 [0] : vector<128x10xf32> to vector<10xf32>
    %29 = vector.shape_cast %28 : vector<10xf32> to vector<1x10xf32>
    %c1_i32 = arith.constant 1 : i32
    %30 = vector.broadcast %c1_i32 : i32 to vector<128x1xi32>
    %31 = arith.cmpi eq, %21, %30 : vector<128x1xi32>
    %cst_16 = arith.constant 0.000000e+00 : f32
    %32 = vector.shape_cast %31 : vector<128x1xi1> to vector<128x1xi1>
    %33 = vector.broadcast %32 : vector<128x1xi1> to vector<128x10xi1>
    %34 = vector.broadcast %cst_16 : f32 to vector<128x10xf32>
    %35 = arith.select %33, %12, %34 : vector<128x10xi1>, vector<128x10xf32>
    %cst_17 = arith.constant dense<0.000000e+00> : vector<10xf32>
    %36 = vector.multi_reduction <add>, %35, %cst_17 [0] : vector<128x10xf32> to vector<10xf32>
    %37 = vector.shape_cast %36 : vector<10xf32> to vector<1x10xf32>
    %c0_18 = arith.constant 0 : index
    %c0_19 = arith.constant 0 : index
    %38 = vector.load %arg4[%c0_18, %c0_19] : memref<2x10xf32, #tpu.memory_space<vmem>>, vector<2x10xf32>
    %39 = tpu.concatenate %29, %37 in 0 : vector<1x10xf32>, vector<1x10xf32> -> vector<2x10xf32>
    %40 = arith.addf %38, %39 : vector<2x10xf32>
    %c0_20 = arith.constant 0 : index
    %c0_21 = arith.constant 0 : index
    %41 = vector.load %arg4[%c0_20, %c0_21] : memref<2x10xf32, #tpu.memory_space<vmem>>, vector<2x10xf32>
    tpu.vector_store %arg4[%c0_20, %c0_21], %40 {strides = array<i32>} : memref<2x10xf32, #tpu.memory_space<vmem>>, vector<2x10xf32>,
    return
  }
  func.func @transform_0(%arg0: i32) -> (i32, i32) {
    %c0_i32 = arith.constant 0 : i32
    %c0_i32_0 = arith.constant 0 : i32
    return %arg0, %c0_i32 : i32, i32
  }
  func.func @transform_1(%arg0: i32) -> (i32, i32) {
    %c0_i32 = arith.constant 0 : i32
    %c0_i32_0 = arith.constant 0 : i32
    %c0_i32_1 = arith.constant 0 : i32
    return %c0_i32, %c0_i32_0 : i32, i32
  }
  func.func @transform_2(%arg0: i32) -> (i32, i32) {
    %c0_i32 = arith.constant 0 : i32
    %c0_i32_0 = arith.constant 0 : i32
    return %arg0, %c0_i32 : i32, i32
  }
  func.func @transform_3(%arg0: i32) -> (i32, i32) {
    %c0_i32 = arith.constant 0 : i32
    %c0_i32_0 = arith.constant 0 : i32
    %c0_i32_1 = arith.constant 0 : i32
    return %c0_i32, %c0_i32_0 : i32, i32
  }
  func.func @transform_4(%arg0: i32) -> (i32, i32) {
    %c0_i32 = arith.constant 0 : i32
    %c0_i32_0 = arith.constant 0 : i32
    %c0_i32_1 = arith.constant 0 : i32
    return %c0_i32, %c0_i32_0 : i32, i32
  }
}

</mosaic_0001>

<bundles_post_ra>
// kernel: tpu_custom_call.1
= control target key start
LH: loop header
LB: loop body
LE: loop exit
PB: predicated region body
PF: predicated region fallthrough
CT: control target
= control target key end

     0   :  { %10 = vsyncpa [#allocation3], 0  ;;  %vm177_vm0 = vcmask 1041408   ;;  %v738_v3 = vmov 0   ;;  %vm128_vm4 = vcmask 80896   ;;  %s1167_s0 = inlined_call_operand.vmem [shape: f32[128,10], index: 0, kind: input, shape index: {}]   ;;  %s1168_s1 = inlined_call_operand.vmem [shape: f32[10,32], index: 1, kind: input, shape index: {}]   ;;  %s1169_s2 = inlined_call_operand.vmem [shape: s32[128,1], index: 2, kind: input, shape index: {}]   ;;  %s1170_s3 = inlined_call_operand.hbm [shape: f32[2,10], index: 3, kind: output, shape index: {0}]   ;;  %s1171_s4 = inlined_call_operand.hbm [shape: f32[1,32], index: 4, kind: output, shape index: {1}]  }
   0x1   :  { %v127_v0 = vld [vmem:[%s1168_s1 + $0x8] sm:$0x3]  ;;  %v773_v1 = vld [vmem:[%s1169_s2 + $0x20] sm:$0xff]  ;;  %v778_v2 = vld [vmem:[%s1169_s2 + $0x10] sm:$0xff]  ;;  %685 = vset.pattern.permute.xlu2 %v738_v3  ;;  %684 = vset.pattern.permute.xlu1 %v738_v3 }
   0x2   :  { %656 = vmatpush.msk.msra.mxu0 %vm177_vm0, %v127_v0  ;;  %vm324_vm1 = vcmp.eq.s32.totalorder %v773_v1, 0  ;;  %vm322_vm2 = vcmp.eq.s32.totalorder %v778_v2, 0  ;;  %v787_v4 = vld [vmem:[%s1169_s2] sm:$0xff]  ;;  %683 = vset.pattern.permute.xlu0 %v738_v3  ;;  %v805_v9 = vld [vmem:[%s1169_s2 + $0x28] sm:$0xff]  ;;  %v810_v10 = vld [vmem:[%s1169_s2 + $0x18] sm:$0xff] }
   0x3   :  { %v126_v5 = vld [vmem:[%s1168_s1] sm:$0xff]  ;;  %v340_v7 = vsel %vm324_vm1, 1, %v738_v3  ;;  %v338_v8 = vsel %vm322_vm2, 1, %v738_v3  ;;  %vm320_vm3 = vcmp.eq.s32.totalorder %v787_v4, 0  ;;  %v816_v12 = vld [vmem:[%s1169_s2 + $0x8] sm:$0xff]  ;;  %673 = vmatpush.msk.msra.mxu1 %vm177_vm0, %v127_v0  ;;  %vm325_vm5 = vcmp.eq.s32.totalorder %v805_v9, 0  ;;  %674 = vmatpush.msk.msra.mxu2 %vm177_vm0, %v127_v0 }
   0x4   :  { %v795_v6 = vld [vmem:[%s1167_s0] sm:$0xff]  ;;  %365 = vperm.xlu2 %685, %v340_v7   ;;  %359 = vperm.xlu1 %684, %v338_v8   ;;  %v336_v11 = vsel %vm320_vm3, 1, %v738_v3  ;;  %vm323_vm6 = vcmp.eq.s32.totalorder %v810_v10, 0  ;;  %vm321_vm7 = vcmp.eq.s32.totalorder %v816_v12, 0  ;;  %v341_v16 = vsel %vm325_vm5, 1, %v738_v3  ;;  %v851_v19 = vld [vmem:[%s1167_s0 + $0x8] sm:$0xff] }
   0x5   :  { %353 = vperm.xlu0 %683, %v336_v11   ;;  %196 = vmatpush.msra.mxu0 %v126_v5  ;;  %v826_v13 = vld [vmem:[%s1167_s0 + $0x20] sm:$0xff]  ;;  %v339_v17 = vsel %vm323_vm6, 1, %v738_v3  ;;  %v337_v18 = vsel %vm321_vm7, 1, %v738_v3  ;;  %v861_v21 = vld [vmem:[%s1169_s2 + $0x38] sm:$0xff]  ;;  %v868_v22 = vld [vmem:[%s1169_s2 + $0x30] sm:$0xff] }
   0x6   :  { %657 = vmatmul.msk.f32.vlgmr.msra.gmra.mxu0 %vm128_vm4, %v795_v6  ;;  %v833_v14 = vld [vmem:[%s1167_s0 + $0x40] sm:$0xff]  ;;  %675 = vmatpush.msk.msra.mxu3 %vm177_vm0, %v127_v0 }
   0x7   :  { %676 = vmatpush.msra.mxu1 %v126_v5  ;;  %v839_v15 = vld [vmem:[%s1167_s0 + $0x60] sm:$0xff]  ;;  %677 = vmatpush.msra.mxu2 %v126_v5 }
   0x8   :  { %661 = vmatmul.msk.f32.vlgmr.msra.gmra.mxu1 %vm128_vm4, %v826_v13  ;;  %665 = vmatmul.msk.f32.vlgmr.msra.gmra.mxu2 %vm128_vm4, %v833_v14  ;;  %v856_v20 = vld [vmem:[%s1169_s2 + $0x40] sm:$0xff] }
   0x9   :  { %678 = vmatpush.msra.mxu3 %v126_v5 }
   0xa   :  { %669 = vmatmul.msk.f32.vlgmr.msra.gmra.mxu3 %vm128_vm4, %v839_v15 }
   0xc   :  { %368 = vperm.xlu2 %685, %v341_v16   ;;  %362 = vperm.xlu1 %684, %v339_v17  }
   0xd   :  { %356 = vperm.xlu0 %683, %v337_v18  }
   0xe   :  { %11 = vsyncpa [#allocation5], 0  ;;  %658 = vmatmul.msk.f32.gmra.mxu0 %vm128_vm4, %v851_v19  ;;  %vm328_vm8 = vcmp.eq.s32.totalorder %v856_v20, 0  ;;  %vm327_vm9 = vcmp.eq.s32.totalorder %v861_v21, 0  ;;  %v877_v23 = vld [vmem:[%s1167_s0 + $0x28] sm:$0xff]  ;;  %vm326_vm10 = vcmp.eq.s32.totalorder %v868_v22, 0 }
   0xf   :  { %v883_v24 = vld [vmem:[%s1167_s0 + $0x48] sm:$0xff]  ;;  %v344_v26 = vsel %vm328_vm8, 1, %v738_v3  ;;  %v343_v27 = vsel %vm327_vm9, 1, %v738_v3  ;;  %v342_v28 = vsel %vm326_vm10, 1, %v738_v3  ;;  %v900_v29 = vld [vmem:[%s1167_s0 + $0x10] sm:$0xff]  ;;  %v905_v30 = vld [vmem:[%s1169_s2 + $0x58] sm:$0xff] }
  0x10   :  { %v888_v25 = vld [vmem:[%s1167_s0 + $0x68] sm:$0xff]  ;;  %662 = vmatmul.msk.f32.gmra.mxu1 %vm128_vm4, %v877_v23  ;;  %666 = vmatmul.msk.f32.gmra.mxu2 %vm128_vm4, %v883_v24  ;;  %v910_v31 = vld [vmem:[%s1169_s2 + $0x50] sm:$0xff]  ;;  %vm331_vm11 = vcmp.eq.s32.totalorder %v905_v30, 0  ;;  %v949_v39 = vld [vmem:[%s1167_s0 + $0x18] sm:$0xff]  ;;  %vm470_vm1 = vcmp.eq.s32.totalorder %v816_v12, 1  ;;  %vm469_vm2 = vcmp.eq.s32.totalorder %v787_v4, 1 }
  0x11   :  { %v917_v32 = vld [vmem:[%s1169_s2 + $0x48] sm:$0xff]  ;;  %vm330_vm12 = vcmp.eq.s32.totalorder %v910_v31, 0  ;;  %v926_v33 = vld [vmem:[%s1167_s0 + $0x30] sm:$0xff]  ;;  %v347_v36 = vsel %vm331_vm11, 1, %v738_v3  ;;  %v316_v42 = vld [vmem:[%s1169_s2 + $0x60] sm:$0xff]  ;;  %v486_v50 = vsel %vm470_vm1, 1, %v738_v3 }
  0x12   :  { %670 = vmatmul.msk.f32.gmra.mxu3 %vm128_vm4, %v888_v25  ;;  %vm329_vm13 = vcmp.eq.s32.totalorder %v917_v32, 0  ;;  %v932_v34 = vld [vmem:[%s1167_s0 + $0x50] sm:$0xff]  ;;  %v346_v37 = vsel %vm330_vm12, 1, %v738_v3  ;;  %v959_v41 = vld [vmem:[%s1169_s2 + $0x68] sm:$0xff]  ;;  %v973_v43 = vld [vmem:[%s1167_s0 + $0x38] sm:$0xff]  ;;  %vm332_vm0 = vcmp.eq.s32.totalorder %v316_v42, 0 }
  0x13   :  { %v937_v35 = vld [vmem:[%s1167_s0 + $0x70] sm:$0xff]  ;;  %v345_v38 = vsel %vm329_vm13, 1, %v738_v3  ;;  %vm333_vm15 = vcmp.eq.s32.totalorder %v959_v41, 0  ;;  %v978_v44 = vld [vmem:[%s1167_s0 + $0x58] sm:$0xff]  ;;  %v348_v48 = vsel %vm332_vm0, 1, %v738_v3  ;;  %v485_v51 = vsel %vm469_vm2, 1, %v738_v3 }
  0x14   :  { %377 = vperm.xlu2 %685, %v344_v26   ;;  %374 = vperm.xlu1 %684, %v343_v27   ;;  %v954_v40 = vld [vmem:[%s1169_s2 + $0x70] sm:$0xff]  ;;  %v983_v45 = vld [vmem:[%s1167_s0 + $0x78] sm:$0xff]  ;;  %v349_v47 = vsel %vm333_vm15, 1, %v738_v3  ;;  %vm473_vm5 = vcmp.eq.s32.totalorder %v773_v1, 1  ;;  %vm472_vm6 = vcmp.eq.s32.totalorder %v810_v10, 1  ;;  %vm471_vm7 = vcmp.eq.s32.totalorder %v778_v2, 1 }
  0x15   :  { %371 = vperm.xlu0 %683, %v342_v28   ;;  %vm334_vm14 = vcmp.eq.s32.totalorder %v954_v40, 0  ;;  %v319_v49 = vld [vmem:[%s1169_s2 + $0x78] sm:$0xff]  ;;  %v489_v53 = vsel %vm473_vm5, 1, %v738_v3  ;;  %v488_v54 = vsel %vm472_vm6, 1, %v738_v3  ;;  %v487_v55 = vsel %vm471_vm7, 1, %v738_v3  ;;  %s740_s2 = smov [#allocation4]  }
  0x16   :  { %659 = vmatmul.msk.f32.gmra.mxu0 %vm128_vm4, %v900_v29  ;;  %v350_v46 = vsel %vm334_vm14, 1, %v738_v3  ;;  %vm335_vm3 = vcmp.eq.s32.totalorder %v319_v49, 0  ;;  %vm476_vm8 = vcmp.eq.s32.totalorder %v861_v21, 1  ;;  %vm475_vm9 = vcmp.eq.s32.totalorder %v868_v22, 1  ;;  %s640_s28 = sshll.u32 %s740_s2, 4  ;;  %s642_s30 = sshll.u32 %s1171_s4, 4  ;;  %s641_s28 = int_to_ptr.vmem [resolvable:$true] %s640_s28  ;;  %s643_s30 = int_to_ptr.hbm [resolvable:$true] %s642_s30 }
  0x17   :  { %v351_v52 = vsel %vm335_vm3, 1, %v738_v3  ;;  %vm474_vm10 = vcmp.eq.s32.totalorder %v805_v9, 1  ;;  %v492_v56 = vsel %vm476_vm8, 1, %v738_v3  ;;  %v491_v57 = vsel %vm475_vm9, 1, %v738_v3  ;;  %s741_s4 = smov [#allocation2]   ;;  %s631_s8 = sshll.u32 %s1170_s3, 4  ;;  %s632_s8 = int_to_ptr.hbm [resolvable:$true] %s631_s8 }
  0x18   :  { %663 = vmatmul.msk.f32.gmra.mxu1 %vm128_vm4, %v926_v33  ;;  %667 = vmatmul.msk.f32.gmra.mxu2 %vm128_vm4, %v932_v34  ;;  %v490_v58 = vsel %vm474_vm10, 1, %v738_v3  ;;  %vm479_vm11 = vcmp.eq.s32.totalorder %v910_v31, 1  ;;  %vm478_vm12 = vcmp.eq.s32.totalorder %v917_v32, 1  ;;  %vm477_vm13 = vcmp.eq.s32.totalorder %v856_v20, 1  ;;  %s629_s5 = sshll.u32 %s741_s4, 4  ;;  %s630_s5 = int_to_ptr.vmem [resolvable:$true] %s629_s5 }
  0x19   :  { %v495_v59 = vsel %vm479_vm11, 1, %v738_v3  ;;  %v494_v60 = vsel %vm478_vm12, 1, %v738_v3  ;;  %v493_v61 = vsel %vm477_vm13, 1, %v738_v3  ;;  %vm482_vm14 = vcmp.eq.s32.totalorder %v959_v41, 1 }
  0x1a   :  { %671 = vmatmul.msk.f32.gmra.mxu3 %vm128_vm4, %v937_v35  ;;  %vm481_vm15 = vcmp.eq.s32.totalorder %v316_v42, 1  ;;  %vm480_vm0 = vcmp.eq.s32.totalorder %v905_v30, 1  ;;  %v498_v62 = vsel %vm482_vm14, 1, %v738_v3  ;;  %vm484_vm1 = vcmp.eq.s32.totalorder %v319_v49, 1 }
  0x1b   :  { %v497_v63 = vsel %vm481_vm15, 1, %v738_v3  ;;  %v496_v0 = vsel %vm480_vm0, 1, %v738_v3  ;;  %vm483_vm2 = vcmp.eq.s32.totalorder %v954_v40, 1  ;;  %v500_v1 = vsel %vm484_vm1, 1, %v738_v3 }
  0x1c   :  { %386 = vperm.xlu2 %685, %v347_v36   ;;  %383 = vperm.xlu1 %684, %v346_v37   ;;  %v499_v2 = vsel %vm483_vm2, 1, %v738_v3  ;;  %vm263_vm9 = vcmask 261120   ;;  %vm24_vm14 = vcmask 253952  }
  0x1d   :  { %380 = vperm.xlu0 %683, %v345_v38  }
  0x1e   :  { %660 = vmatmul.msk.f32.gmra.mxu0 %vm128_vm4, %v949_v39 }
  0x20   :  { %664 = vmatmul.msk.f32.gmra.mxu1 %vm128_vm4, %v973_v43  ;;  %668 = vmatmul.msk.f32.gmra.mxu2 %vm128_vm4, %v978_v44 }
  0x22   :  { %672 = vmatmul.msk.f32.gmra.mxu3 %vm128_vm4, %v983_v45 }
  0x24   :  { %395 = vperm.xlu2 %685, %v350_v46   ;;  %392 = vperm.xlu1 %684, %v349_v47  }
  0x25   :  { %389 = vperm.xlu0 %683, %v348_v48  }
  0x2c   :  { %505 = vperm.xlu2 %685, %v486_v50   ;;  %502 = vperm.xlu1 %684, %v485_v51  }
  0x2d   :  { %398 = vperm.xlu0 %683, %v351_v52  }
  0x34   :  { %514 = vperm.xlu2 %685, %v489_v53   ;;  %511 = vperm.xlu1 %684, %v488_v54  }
  0x35   :  { %508 = vperm.xlu0 %683, %v487_v55  }
  0x3c   :  { %523 = vperm.xlu2 %685, %v492_v56   ;;  %520 = vperm.xlu1 %684, %v491_v57  }
  0x3d   :  { %517 = vperm.xlu0 %683, %v490_v58  }
  0x44   :  { %532 = vperm.xlu2 %685, %v495_v59   ;;  %529 = vperm.xlu1 %684, %v494_v60  }
  0x45   :  { %526 = vperm.xlu0 %683, %v493_v61  }
  0x4c   :  { %541 = vperm.xlu2 %685, %v498_v62   ;;  %538 = vperm.xlu1 %684, %v497_v63  }
  0x4d   :  { %535 = vperm.xlu0 %683, %v496_v0  }
  0x54   :  { %547 = vperm.xlu1 %684, %v500_v1  }
  0x55   :  { %544 = vperm.xlu0 %683, %v499_v2  }
  0x5e   :  { %v366_v4 = vpop.permute.xlu2 %365 }
  0x5f   :  { %vm404_vm8 = vcmp.eq.s32.totalorder %v366_v4, 1 }
  0x60   :  { %v420_v50 = vsel %vm404_vm8, %v826_v13, 0.0 }
  0x61   :  { %v439_v57 = vsel %vm128_vm4, %v420_v50, 0.0 }
  0x66   :  { %v369_v5 = vpop.permute.xlu2 %368 }
  0x67   :  { %vm405_vm10 = vcmp.eq.s32.totalorder %v369_v5, 1 }
  0x68   :  { %v421_v60 = vsel %vm405_vm10, %v877_v23, 0.0 }
  0x69   :  { %v441_v4 = vsel %vm128_vm4, %v421_v60, 0.0 }
  0x6e   :  { %v1028_v9 = vpop.permute.xlu2 %377 }
  0x6f   :  { %vm408_vm13 = vcmp.eq.s32.totalorder %v1028_v9, 1 }
  0x76   :  { %v360_v7 = vpop.permute.xlu1 %359  ;;  %v1030_v12 = vpop.permute.xlu2 %386 }
  0x77   :  { %v354_v8 = vpop.permute.xlu0 %353  ;;  %vm402_vm6 = vcmp.eq.s32.totalorder %v360_v7, 1  ;;  %vm411_vm15 = vcmp.eq.s32.totalorder %v1030_v12, 1 }
  0x78   :  { %vm400_vm5 = vcmp.eq.s32.totalorder %v354_v8, 1  ;;  %v418_v27 = vsel %vm402_vm6, %v900_v29, 0.0 }
  0x79   :  { %v416_v3 = vsel %vm400_vm5, %v795_v6, 0.0  ;;  %v435_v36 = vsel %vm128_vm4, %v418_v27, 0.0 }
  0x7a   :  { %v432_v26 = vsel %vm128_vm4, %v416_v3, 0.0 }
  0x7e   :  { %v363_v10 = vpop.permute.xlu1 %362  ;;  %v1039_v31 = vpop.permute.xlu2 %395 }
  0x7f   :  { %v357_v11 = vpop.permute.xlu0 %356  ;;  %vm403_vm7 = vcmp.eq.s32.totalorder %v363_v10, 1 }
  0x80   :  { %vm401_vm3 = vcmp.eq.s32.totalorder %v357_v11, 1  ;;  %v419_v38 = vsel %vm403_vm7, %v949_v39, 0.0 }
  0x81   :  { %v417_v17 = vsel %vm401_vm3, %v851_v19, 0.0  ;;  %v437_v49 = vsel %vm128_vm4, %v419_v38, 0.0 }
  0x82   :  { %v433_v22 = vsel %vm128_vm4, %v417_v17, 0.0 }
  0x83   :  { %v198_v16 = vpop.f32.mrf.mxu0  ;;  %v434_v28 = vadd.f32 %v433_v22, %v432_v26 }
  0x84   :  { %v247_v46 = vmul.f32 %v198_v16, %v198_v16 }
  0x85   :  { %v210_v21 = vpop.f32.mrf.mxu1  ;;  %v436_v40 = vadd.f32 %v435_v36, %v434_v28  ;;  %v739_v28 = vmov 0.0  }
  0x86   :  { %v1033_v18 = vpop.permute.xlu1 %374  ;;  %v264_v53 = vsel %vm263_vm9, %v247_v46, 0.0  ;;  %v506_v58 = vpop.permute.xlu2 %505  ;;  %v251_v5 = vmul.f32 %v210_v21, %v210_v21  ;;  %25 = vst.msk [vmem:[#allocation4] sm:$0x1] %vm24_vm14, %v739_v28 }
  0x87   :  { %v372_v20 = vpop.permute.xlu0 %371  ;;  %v438_v51 = vadd.f32 %v437_v49, %v436_v40  ;;  %vm407_vm12 = vcmp.eq.s32.totalorder %v1033_v18, 1  ;;  %vm550_vm2 = vcmp.eq.s32.totalorder %v506_v58, 1 }
  0x88   :  { %vm406_vm11 = vcmp.eq.s32.totalorder %v372_v20, 1  ;;  %v271_v22 = vsel %vm263_vm9, %v251_v5, 0.0  ;;  %v423_v18 = vsel %vm407_vm12, %v973_v43, 0.0  ;;  %v566_v58 = vsel %vm550_vm2, %v851_v19, 0.0 }
  0x89   :  { %v440_v61 = vadd.f32 %v439_v57, %v438_v51  ;;  %v422_v7 = vsel %vm406_vm11, %v926_v33, 0.0  ;;  %v445_v51 = vsel %vm128_vm4, %v423_v18, 0.0  ;;  %v582_v19 = vsel %vm128_vm4, %v566_v58, 0.0 }
  0x8a   :  { %v443_v20 = vsel %vm128_vm4, %v422_v7, 0.0 }
  0x8b   :  { %v201_v30 = vpop.f32.mrf.mxu0  ;;  %v1041_v32 = vpop.f32.mrf.mxu2  ;;  %v442_v8 = vadd.f32 %v441_v4, %v440_v61 }
  0x8c   :  { %v248_v47 = vmul.f32 %v201_v30, %v201_v30 }
  0x8d   :  { %v213_v42 = vpop.f32.mrf.mxu1  ;;  %v1049_v48 = vpop.f32.mrf.mxu3  ;;  %v444_v30 = vadd.f32 %v443_v20, %v442_v8 }
  0x8e   :  { %v1044_v37 = vpop.permute.xlu1 %383  ;;  %v265_v54 = vsel %vm263_vm9, %v248_v47, 0.0  ;;  %v252_v16 = vmul.f32 %v213_v42, %v213_v42  ;;  %v424_v47 = vsel %vm408_vm13, %v833_v14, 0.0  ;;  %v515_v49 = vpop.permute.xlu2 %514 }
  0x8f   :  { %v1047_v41 = vpop.permute.xlu0 %380  ;;  %v266_v62 = vadd.f32 %v265_v54, %v264_v53  ;;  %v446_v54 = vadd.f32 %v445_v51, %v444_v30  ;;  %vm410_vm3 = vcmp.eq.s32.totalorder %v1044_v37, 1  ;;  %vm553_vm7 = vcmp.eq.s32.totalorder %v515_v49, 1 }
  0x90   :  { %v273_v42 = vsel %vm263_vm9, %v252_v16, 0.0  ;;  %vm409_vm1 = vcmp.eq.s32.totalorder %v1047_v41, 1  ;;  %v427_v41 = vsel %vm411_vm15, %v978_v44, 0.0  ;;  %vm414_vm15 = vcmp.eq.s32.totalorder %v1039_v31, 1 }
  0x93   :  { %v204_v52 = vpop.f32.mrf.mxu0  ;;  %v225_v56 = vpop.f32.mrf.mxu2 }
  0x94   :  { %v249_v55 = vmul.f32 %v204_v52, %v204_v52  ;;  %v255_v52 = vmul.f32 %v1041_v32, %v1041_v32  ;;  %v256_v9 = vmul.f32 %v225_v56, %v225_v56 }
  0x95   :  { %v216_v0 = vpop.f32.mrf.mxu1  ;;  %v1062_v2 = vpop.f32.mrf.mxu3 }
  0x96   :  { %v1056_v59 = vpop.permute.xlu1 %392  ;;  %v267_v1 = vsel %vm263_vm9, %v249_v55, 0.0  ;;  %v253_v21 = vmul.f32 %v216_v0, %v216_v0  ;;  %v425_v0 = vsel %vm409_vm1, %v883_v24, 0.0  ;;  %v279_v56 = vsel %vm263_vm9, %v255_v52, 0.0  ;;  %v524_v30 = vpop.permute.xlu2 %523 }
  0x97   :  { %v1059_v63 = vpop.permute.xlu0 %389  ;;  %v268_v10 = vadd.f32 %v267_v1, %v266_v62  ;;  %v447_v62 = vsel %vm128_vm4, %v424_v47, 0.0  ;;  %v449_v12 = vsel %vm128_vm4, %v425_v0, 0.0  ;;  %vm413_vm12 = vcmp.eq.s32.totalorder %v1056_v59, 1 }
  0x98   :  { %v275_v53 = vsel %vm263_vm9, %v253_v21, 0.0  ;;  %v448_v5 = vadd.f32 %v447_v62, %v446_v54  ;;  %vm412_vm8 = vcmp.eq.s32.totalorder %v1059_v63, 1  ;;  %vm556_vm13 = vcmp.eq.s32.totalorder %v524_v30, 1 }
  0x99   :  { %v572_v59 = vsel %vm556_vm13, %v973_v43, 0.0 }
  0x9a   :  { %v450_v18 = vadd.f32 %v449_v12, %v448_v5  ;;  %v594_v43 = vsel %vm128_vm4, %v572_v59, 0.0 }
  0x9b   :  { %v207_v11 = vpop.f32.mrf.mxu0  ;;  %v228_v3 = vpop.f32.mrf.mxu2 }
  0x9c   :  { %v250_v17 = vmul.f32 %v207_v11, %v207_v11  ;;  %v257_v4 = vmul.f32 %v228_v3, %v228_v3  ;;  %v281_v11 = vsel %vm263_vm9, %v256_v9, 0.0 }
  0x9d   :  { %v219_v40 = vpop.f32.mrf.mxu1  ;;  %v240_v57 = vpop.f32.mrf.mxu3 }
  0x9e   :  { %v269_v26 = vsel %vm263_vm9, %v250_v17, 0.0  ;;  %v503_v27 = vpop.permute.xlu1 %502  ;;  %v254_v46 = vmul.f32 %v219_v40, %v219_v40  ;;  %v259_v17 = vmul.f32 %v1049_v48, %v1049_v48  ;;  %v260_v48 = vmul.f32 %v1062_v2, %v1062_v2 }
  0x9f   :  { %v270_v36 = vadd.f32 %v269_v26, %v268_v10  ;;  %v1074_v38 = vpop.permute.xlu0 %398  ;;  %vm549_vm0 = vcmp.eq.s32.totalorder %v503_v27, 1  ;;  %v426_v27 = vsel %vm410_vm3, %v932_v34, 0.0 }
  0xa0   :  { %v565_v60 = vsel %vm549_vm0, %v795_v6, 0.0  ;;  %v277_v61 = vsel %vm263_vm9, %v254_v46, 0.0  ;;  %v287_v51 = vsel %vm263_vm9, %v259_v17, 0.0  ;;  %v289_v63 = vsel %vm263_vm9, %v260_v48, 0.0 }
  0xa1   :  { %v272_v50 = vadd.f32 %v271_v22, %v270_v36  ;;  %v581_v7 = vsel %vm128_vm4, %v565_v60, 0.0  ;;  %v283_v22 = vsel %vm263_vm9, %v257_v4, 0.0  ;;  %v428_v60 = vsel %vm412_vm8, %v839_v15, 0.0 }
  0xa2   :  { %v583_v20 = vadd.f32 %v582_v19, %v581_v7  ;;  %v455_v58 = vsel %vm128_vm4, %v428_v60, 0.0  ;;  %vm22_vm0 = vcmask 74752   ;;  %v533_v7 = vpop.permute.xlu2 %532  ;;  %vm415_vm1 = vcmp.eq.s32.totalorder %v1074_v38, 1 }
  0xa3   :  { %v274_v55 = vadd.f32 %v273_v42, %v272_v50  ;;  %v231_v1 = vpop.f32.mrf.mxu2  ;;  %v569_v42 = vsel %vm553_vm7, %v826_v13, 0.0  ;;  %v451_v50 = vsel %vm128_vm4, %v426_v27, 0.0  ;;  %v261_v13 = vmul.f32 %v240_v57, %v240_v57  ;;  %23 = vst.msk [vmem:[#allocation2] sm:$0x3] %vm22_vm0, %v739_v28 }
  0xa4   :  { %v258_v16 = vmul.f32 %v231_v1, %v231_v1  ;;  %v588_v2 = vsel %vm128_vm4, %v569_v42, 0.0  ;;  %v452_v54 = vadd.f32 %v451_v50, %v450_v18  ;;  %v430_v17 = vsel %vm414_vm15, %v937_v35, 0.0 }
  0xa5   :  { %v276_v32 = vadd.f32 %v275_v53, %v274_v55  ;;  %v243_v49 = vpop.f32.mrf.mxu3  ;;  %v291_v57 = vsel %vm263_vm9, %v261_v13, 0.0  ;;  %vm559_vm3 = vcmp.eq.s32.totalorder %v533_v7, 1  ;;  %v431_v38 = vsel %vm415_vm1, %v983_v45, 0.0 }
  0xa6   :  { %v512_v6 = vpop.permute.xlu1 %511  ;;  %v285_v47 = vsel %vm263_vm9, %v258_v16, 0.0  ;;  %v459_v30 = vsel %vm128_vm4, %v430_v17, 0.0  ;;  %v461_v42 = vsel %vm128_vm4, %v431_v38, 0.0 }
  0xa7   :  { %v278_v8 = vadd.f32 %v277_v61, %v276_v32  ;;  %vm552_vm5 = vcmp.eq.s32.totalorder %v512_v6, 1  ;;  %v509_v10 = vpop.permute.xlu0 %508  ;;  %v262_v61 = vmul.f32 %v243_v49, %v243_v49 }
  0xa8   :  { %vm551_vm6 = vcmp.eq.s32.totalorder %v509_v10, 1  ;;  %v568_v26 = vsel %vm552_vm5, %v949_v39, 0.0  ;;  %v453_v39 = vsel %vm128_vm4, %v427_v41, 0.0 }
  0xa9   :  { %v280_v3 = vadd.f32 %v279_v56, %v278_v8  ;;  %v567_v21 = vsel %vm551_vm6, %v900_v29, 0.0  ;;  %v586_v37 = vsel %vm128_vm4, %v568_v26, 0.0  ;;  %v454_v6 = vadd.f32 %v453_v39, %v452_v54 }
  0xaa   :  { %v584_v40 = vsel %vm128_vm4, %v567_v21, 0.0 }
  0xab   :  { %v282_v36 = vadd.f32 %v281_v11, %v280_v3  ;;  %v585_v46 = vadd.f32 %v584_v40, %v583_v20  ;;  %v456_v12 = vadd.f32 %v455_v58, %v454_v6  ;;  %v575_v40 = vsel %vm559_vm3, %v932_v34, 0.0 }
  0xad   :  { %v284_v29 = vadd.f32 %v283_v22, %v282_v36  ;;  %v587_v52 = vadd.f32 %v586_v37, %v585_v46  ;;  %v600_v37 = vsel %vm128_vm4, %v575_v40, 0.0 }
  0xae   :  { %v521_v53 = vpop.permute.xlu1 %520 }
  0xaf   :  { %v286_v55 = vadd.f32 %v285_v47, %v284_v29  ;;  %vm555_vm10 = vcmp.eq.s32.totalorder %v521_v53, 1  ;;  %v518_v9 = vpop.permute.xlu0 %517  ;;  %v589_v32 = vadd.f32 %v588_v2, %v587_v52  ;;  %v542_v47 = vpop.permute.xlu2 %541  ;;  %v246_v53 = vld [vmem:[#allocation4] sm:$0x1] }
  0xb0   :  { %vm554_vm11 = vcmp.eq.s32.totalorder %v518_v9, 1  ;;  %v571_v41 = vsel %vm555_vm10, %v926_v33, 0.0  ;;  %v293_v33 = vsel %vm263_vm9, %v262_v61, 0.0  ;;  %vm562_vm7 = vcmp.eq.s32.totalorder %v542_v47, 1 }
  0xb1   :  { %v288_v62 = vadd.f32 %v287_v51, %v286_v55  ;;  %v570_v0 = vsel %vm554_vm11, %v877_v23, 0.0  ;;  %v592_v5 = vsel %vm128_vm4, %v571_v41, 0.0  ;;  %v429_v23 = vsel %vm413_vm12, %v888_v25, 0.0 }
  0xb2   :  { %v590_v1 = vsel %vm128_vm4, %v570_v0, 0.0  ;;  %v457_v3 = vsel %vm128_vm4, %v429_v23, 0.0 }
  0xb3   :  { %v290_v56 = vadd.f32 %v289_v63, %v288_v62  ;;  %v591_v4 = vadd.f32 %v590_v1, %v589_v32  ;;  %v458_v21 = vadd.f32 %v457_v3, %v456_v12  ;;  %v618_v12 = vld [vmem:[#allocation2] sm:$0x3] }
  0xb5   :  { %v292_v8 = vadd.f32 %v291_v57, %v290_v56  ;;  %v593_v10 = vadd.f32 %v592_v5, %v591_v4 }
  0xb6   :  { %v530_v11 = vpop.permute.xlu1 %529 }
  0xb7   :  { %v294_v16 = vadd.f32 %v293_v33, %v292_v8  ;;  %vm558_vm2 = vcmp.eq.s32.totalorder %v530_v11, 1  ;;  %v527_v19 = vpop.permute.xlu0 %526  ;;  %v595_v26 = vadd.f32 %v594_v43, %v593_v10 }
  0xb8   :  { %vm557_vm9 = vcmp.eq.s32.totalorder %v527_v19, 1  ;;  %v574_v22 = vsel %vm558_vm2, %v883_v24, 0.0 }
  0xb9   :  { %v295_v20 = vrot.slane %v294_v16, 4  ;;  %v573_v28 = vsel %vm557_vm9, %v833_v14, 0.0  ;;  %v598_v36 = vsel %vm128_vm4, %v574_v22, 0.0  ;;  %v460_v14 = vadd.f32 %v459_v30, %v458_v21 }
  0xba   :  { %v596_v27 = vsel %vm128_vm4, %v573_v28, 0.0 }
  0xbb   :  { %v296_v18 = vadd.f32 %v295_v20, %v294_v16  ;;  %v597_v31 = vadd.f32 %v596_v27, %v595_v26  ;;  %v462_v49 = vadd.f32 %v461_v42, %v460_v14 }
  0xbd   :  { %v297_v24 = vrot.slane %v296_v18, 2  ;;  %v599_v48 = vadd.f32 %v598_v36, %v597_v31  ;;  %v463_v9 = vrot.slane %v462_v49, 4 }
  0xbe   :  { %v539_v46 = vpop.permute.xlu1 %538 }
  0xbf   :  { %v298_v39 = vadd.f32 %v297_v24, %v296_v18  ;;  %vm561_vm5 = vcmp.eq.s32.totalorder %v539_v46, 1  ;;  %v536_v29 = vpop.permute.xlu0 %535  ;;  %v601_v34 = vadd.f32 %v600_v37, %v599_v48  ;;  %v464_v41 = vadd.f32 %v463_v9, %v462_v49 }
  0xc0   :  { %vm560_vm6 = vcmp.eq.s32.totalorder %v536_v29, 1  ;;  %v577_v51 = vsel %vm561_vm5, %v839_v15, 0.0  ;;  %v578_v15 = vsel %vm562_vm7, %v888_v25, 0.0 }
  0xc1   :  { %v299_v50 = vrot.slane %v298_v39, 1  ;;  %v576_v52 = vsel %vm560_vm6, %v978_v44, 0.0  ;;  %v604_v55 = vsel %vm128_vm4, %v577_v51, 0.0  ;;  %v606_v62 = vsel %vm128_vm4, %v578_v15, 0.0 }
  0xc2   :  { %v602_v13 = vsel %vm128_vm4, %v576_v52, 0.0  ;;  %v465_v56 = vrot.slane %v464_v41, 2 }
  0xc3   :  { %v300_v2 = vadd.f32 %v299_v50, %v298_v39  ;;  %v603_v54 = vadd.f32 %v602_v13, %v601_v34 }
  0xc4   :  { %v466_v5 = vadd.f32 %v465_v56, %v464_v41 }
  0xc5   :  { %v605_v60 = vadd.f32 %v604_v55, %v603_v54  ;;  %v301_v44 = vadd.f32 %v300_v2, %v246_v53 }
  0xc6   :  { %v548_v63 = vpop.permute.xlu1 %547  ;;  %v467_v59 = vrot.slane %v466_v5, 1 }
  0xc7   :  { %vm564_vm8 = vcmp.eq.s32.totalorder %v548_v63, 1  ;;  %v545_v61 = vpop.permute.xlu0 %544  ;;  %303 = vst.msk [vmem:[#allocation4] sm:$0x1] %vm24_vm14, %v301_v44  ;;  %v607_v57 = vadd.f32 %v606_v62, %v605_v60  ;;  %vm619_vm14 = vcmask 1040384  }
  0xc8   :  { %vm563_vm10 = vcmp.eq.s32.totalorder %v545_v61, 1  ;;  %645 = dma.vmem_to_hbm [thread:$0]  %s641_s28, 16, %s643_s30, [#allocation5]   ;;  %v580_v0 = vsel %vm564_vm8, %v983_v45, 0.0  ;;  %v468_v10 = vadd.f32 %v467_v59, %v466_v5 }
  0xc9   :  { %v579_v32 = vsel %vm563_vm10, %v937_v35, 0.0  ;;  %v610_v58 = vsel %vm128_vm4, %v580_v0, 0.0 }
  0xca   :  { %v608_v25 = vsel %vm128_vm4, %v579_v32, 0.0 }
  0xcb   :  { %v609_v1 = vadd.f32 %v608_v25, %v607_v57 }
  0xcd   :  { %v611_v4 = vadd.f32 %v610_v58, %v609_v1 }
  0xcf   :  { %v612_v6 = vrot.slane %v611_v4, 4 }
  0xd1   :  { %v613_v33 = vadd.f32 %v612_v6, %v611_v4 }
  0xd3   :  { %v614_v23 = vrot.slane %v613_v33, 2 }
  0xd5   :  { %v615_v7 = vadd.f32 %v614_v23, %v613_v33 }
  0xd7   :  { %v616_v8 = vrot.slane %v615_v7, 1 }
  0xd9   :  { %v617_v45 = vadd.f32 %v616_v8, %v615_v7 }
  0xdb   :  { %v620_v35 = vsel %vm619_vm14, %v468_v10, %v617_v45 }
  0xdc   :  { %v621_v11 = vadd.f32 %v620_v35, %v618_v12 }
  0xde   :  { %623 = vst.msk [vmem:[#allocation2] sm:$0x3] %vm22_vm0, %v621_v11 }
  0xdf   :  { %634 = dma.vmem_to_hbm [thread:$0]  %s630_s5, 32, %s632_s8, [#allocation3]  }
  0xe0   :  { %734 = dma.done.wait [#allocation3], 32  }
  0xe1   :  { %735 = vsyncadd [#allocation3], 4294967264 }
  0xe2   :  { %736 = dma.done.wait [#allocation5], 16  }
  0xe3   :  { %737 = vsyncadd [#allocation5], 4294967280 }
  0xe4   :  { %654 = vsyncpa [#allocation3], 1 }
  0xe5   :  { %655 = vsyncpa [#allocation5], 1 }

</bundles_post_ra>
